<compile_context>
chip_gen: v6e
topology: v6e:2x2x1
jax: 0.10.0
libtpu: 0.0.40
codegen_flags: <defaults>
</compile_context>

<pallas_src>
import functools

import jax
import jax.numpy as jnp
from jax.experimental import pallas as pl
from jax.experimental.pallas import tpu as pltpu


# --------------------------------------------------------------------------------------
# Fused Pallas kernel
# --------------------------------------------------------------------------------------

def _fused_kernel(*refs, n_blocks, K0, Ks, dils, pads, T_seq):
    """refs = [x, E, W_l1, b_l1, (W1_i, b1_i, M2_i, b2_i) * n_blocks, W_sh, b_sh, out]."""
    idx = 0
    x_ref = refs[idx]; idx += 1
    e_ref = refs[idx]; idx += 1
    wl1_ref = refs[idx]; idx += 1
    bl1_ref = refs[idx]; idx += 1
    blk_refs = []
    for _ in range(n_blocks):
        blk_refs.append(tuple(refs[idx:idx + 4]))
        idx += 4
    wsh_ref = refs[idx]; idx += 1
    bsh_ref = refs[idx]; idx += 1
    out_ref = refs[idx]

    # embed: Linear(2, C) + ReLU, block-diag over joints -> (T, J*C), lane-dense.
    h = jnp.maximum(
        jnp.dot(x_ref[0], e_ref[...], preferred_element_type=jnp.float32), 0.0)

    # l1_conv + folded BN + ReLU: im2col the K0 taps -> single MXU matmul.
    t_cur = T_seq
    t_next = t_cur - (K0 - 1)
    cols = jnp.concatenate([h[k:k + t_next, :] for k in range(K0)], axis=1)
    h = jnp.maximum(
        jnp.dot(cols, wl1_ref[...], preferred_element_type=jnp.float32) + bl1_ref[...],
        0.0)
    t_cur = t_next

    # residual blocks
    for i in range(n_blocks):
        w1_ref, b1_ref, m2_ref, b2_ref = blk_refs[i]
        K, d, pad = Ks[i], dils[i], pads[i]
        t_next = t_cur - (K - 1) * d
        res = h[pad:pad + t_next, :]
        cols = jnp.concatenate([h[k * d:k * d + t_next, :] for k in range(K)], axis=1)
        y1 = jnp.maximum(
            jnp.dot(cols, w1_ref[...], preferred_element_type=jnp.float32) + b1_ref[...],
            0.0)
        # (I + spatial-mix) and pointwise conv2 (+BN2 scale) are pre-folded into M2.
        h = res + jnp.maximum(
            jnp.dot(y1, m2_ref[...], preferred_element_type=jnp.float32) + b2_ref[...],
            0.0)
        t_cur = t_next

    # shrink (final temporal length == 1); output padded to 128 lanes.
    out_ref[0] = (jnp.dot(h, wsh_ref[...], preferred_element_type=jnp.float32)
                  + bsh_ref[...])


# --------------------------------------------------------------------------------------
# Wrapper
# --------------------------------------------------------------------------------------

def _round_up(n, m):
    return ((n + m - 1) // m) * m


def pallas_forward(folded, x, meta):
    B, T, J, _ = x.shape
    coords = x[..., :2].reshape(B, T, 2 * J)          # (B, T, 2J), index j*2 + f
    pad_in = folded['E'].shape[0]
    coords_p = jnp.zeros((B, T, pad_in), jnp.float32).at[..., :2 * J].set(coords)

    K0, Ks, dils, pads = meta['K0'], meta['Ks'], meta['dils'], meta['pads']
    t_cur = T - (K0 - 1)
    for K, d in zip(Ks, dils):
        t_cur -= (K - 1) * d
    assert t_cur == 1, "V4 requires input length == receptive field (final T must be 1)"

    cout_pad = folded['W_sh'].shape[1]
    kernel = functools.partial(
        _fused_kernel, n_blocks=len(Ks), K0=K0, Ks=tuple(Ks), dils=tuple(dils),
        pads=tuple(pads), T_seq=T)

    def full_spec(a):
        nd = a.ndim
        return pl.BlockSpec(a.shape, lambda b, _nd=nd: (0,) * _nd)

    ops = [coords_p, folded['E'], folded['W_l1'], folded['b_l1']]
    for blk in folded['blocks']:
        ops += [blk['W1'], blk['b1'], blk['M2'], blk['b2']]
    ops += [folded['W_sh'], folded['b_sh']]

    in_specs = [pl.BlockSpec((1, T, pad_in), lambda b: (b, 0, 0))]
    in_specs += [full_spec(a) for a in ops[1:]]

    out = pl.pallas_call(
        kernel,
        out_shape=jax.ShapeDtypeStruct((B, 1, cout_pad), jnp.float32),
        grid=(B,),
        in_specs=in_specs,
        out_specs=pl.BlockSpec((1, 1, cout_pad), lambda b: (b, 0, 0)),
        compiler_params=pltpu.CompilerParams(dimension_semantics=("parallel",)),
    )(*ops)

    cout = meta['num_joints_out'] * 3
    return out[:, :, :cout].reshape(B, 1, meta['num_joints_out'], 3)


# --------------------------------------------------------------------------------------
# Host-side folding of raw (PyTorch-layout) params into kernel operands
# --------------------------------------------------------------------------------------

def fold_params(raw, filter_widths, num_joints_in, num_joints_out, channels=32, eps=1e-5):
    J, C = num_joints_in, channels
    JC = J * C
    eyeJ = jnp.eye(J, dtype=jnp.float32)
    eyeC = jnp.eye(C, dtype=jnp.float32)

    def bn_fold(bn):
        scale = bn['gamma'] / jnp.sqrt(bn['var'] + eps)
        bias = bn['beta'] - bn['mean'] * scale
        return scale, bias

    # embed: Linear(2, C) block-diag over joints, rows zero-padded to 128 lanes.
    E_core = jnp.kron(eyeJ, raw['embed_w'].T)                       # (2J, JC)
    pad_in = _round_up(2 * J, 128)
    E = jnp.zeros((pad_in, JC), jnp.float32).at[:2 * J, :].set(E_core)

    # l1_conv + l1_bn (scale folded into weights, im2col layout over K0 taps).
    K0 = filter_widths[0]
    s1, b1 = bn_fold(raw['l1_bn'])
    W_l1 = jnp.concatenate(
        [jnp.kron(eyeJ, raw['l1_w'][:, :, 0, k].T * s1[None, :]) for k in range(K0)],
        axis=0)                                                      # (K0*JC, JC)
    b_l1 = jnp.tile(b1, J)[None, :]                                  # (1, JC)

    blocks, Ks, dils, pads = [], [], [], []
    d = filter_widths[0]
    for i, blk in enumerate(raw['blocks']):
        K = filter_widths[i + 1]
        sc1, bi1 = bn_fold(blk['bn1'])
        sc2, bi2 = bn_fold(blk['bn2'])
        W1 = jnp.concatenate(
            [jnp.kron(eyeJ, blk['w1'][:, :, 0, k].T * sc1[None, :]) for k in range(K)],
            axis=0)                                                  # (K*JC, JC)
        b1b = jnp.tile(bi1, J)[None, :]
        # spatial joint-mix (Conv2d(J,1,(1,1)) broadcast-added back) as a (JC,JC) matrix.
        S = jnp.kron(blk['w_sp'][:, None] * jnp.ones((1, J), jnp.float32), eyeC)
        W2 = jnp.kron(eyeJ, blk['w2'][:, :, 0, 0].T * sc2[None, :])
        M2 = (jnp.eye(JC, dtype=jnp.float32) + S) @ W2               # (JC, JC)
        b2b = jnp.tile(bi2, J)[None, :]
        blocks.append({'W1': W1, 'b1': b1b, 'M2': M2, 'b2': b2b})
        Ks.append(K)
        dils.append(d)
        pads.append((K - 1) * d // 2)
        d *= K

    # shrink: Conv1d(C*J, 3*Jout, 1); PyTorch channel index is c*J + j, ours is j*C + c.
    cout = num_joints_out * 3
    cout_pad = _round_up(cout, 128)
    Wsh = raw['shrink_w'][:, :, 0].reshape(cout, C, J).transpose(2, 1, 0).reshape(JC, cout)
    Wsh_p = jnp.zeros((JC, cout_pad), jnp.float32).at[:, :cout].set(Wsh)
    bsh_p = jnp.zeros((1, cout_pad), jnp.float32).at[0, :cout].set(raw['shrink_b'])

    folded = {'E': E, 'W_l1': W_l1, 'b_l1': b_l1, 'blocks': blocks,
              'W_sh': Wsh_p, 'b_sh': bsh_p}
    meta = {'K0': K0, 'Ks': Ks, 'dils': dils, 'pads': pads,
            'num_joints_out': num_joints_out}
    return folded, meta


# --------------------------------------------------------------------------------------
# Pure-JAX reference (mirrors the PyTorch ops directly; for correctness check only)
# --------------------------------------------------------------------------------------

def ref_forward(raw, x, filter_widths, num_joints_out, eps=1e-5):
    B, T, J, _ = x.shape
    coords = x[..., :2]
    emb = jnp.maximum(jnp.einsum('btjf,cf->btjc', coords, raw['embed_w']), 0.0)
    h = emb.transpose(0, 3, 2, 1)                                    # (B, C, J, T)

    def bn_apply(v, bn):
        scale = bn['gamma'] / jnp.sqrt(bn['var'] + eps)
        bias = bn['beta'] - bn['mean'] * scale
        return v * scale[None, :, None, None] + bias[None, :, None, None]

    def tconv(v, w, d):
        K = w.shape[-1]
        T_out = v.shape[-1] - (K - 1) * d
        out = jnp.zeros(v.shape[:1] + (w.shape[0],) + v.shape[2:3] + (T_out,), jnp.float32)
        for k in range(K):
            out = out + jnp.einsum('bcjt,dc->bdjt', v[..., k * d:k * d + T_out],
                                   w[:, :, 0, k])
        return out

    h = jnp.maximum(bn_apply(tconv(h, raw['l1_w'], 1), raw['l1_bn']), 0.0)
    d = filter_widths[0]
    for i, blk in enumerate(raw['blocks']):
        K = filter_widths[i + 1]
        pad = (K - 1) * d // 2
        res = h[..., pad:h.shape[-1] - pad]
        y1 = jnp.maximum(bn_apply(tconv(h, blk['w1'], d), blk['bn1']), 0.0)
        x_sp = jnp.einsum('bcjt,j->bct', y1, blk['w_sp'])
        y = y1 + x_sp[:, :, None, :]
        y2 = jnp.maximum(
            bn_apply(jnp.einsum('bcjt,dc->bdjt', y, blk['w2'][:, :, 0, 0]), blk['bn2']),
            0.0)
        h = res + y2
        d *= K
    flat = h.reshape(B, -1)                                          # (B, C*J), T == 1
    out = flat @ raw['shrink_w'][:, :, 0].T + raw['shrink_b']
    return out.reshape(B, 1, num_joints_out, 3)


# --------------------------------------------------------------------------------------
# Deterministic raw (PyTorch-layout) parameter init
# --------------------------------------------------------------------------------------

def init_raw_params(key, num_joints_in, filter_widths, num_joints_out, channels=32):
    C, J = channels, num_joints_in
    keys = iter(jax.random.split(key, 64))

    def nrm(shape, scale):
        return scale * jax.random.normal(next(keys), shape, jnp.float32)

    def bn():
        return {'gamma': 1.0 + 0.1 * jax.random.normal(next(keys), (C,), jnp.float32),
                'beta': 0.1 * jax.random.normal(next(keys), (C,), jnp.float32),
                'mean': 0.1 * jax.random.normal(next(keys), (C,), jnp.float32),
                'var': 1.0 + 0.1 * jnp.abs(jax.random.normal(next(keys), (C,), jnp.float32))}

    raw = {'embed_w': nrm((C, 2), 1.0 / jnp.sqrt(2.0)),
           'l1_w': nrm((C, C, 1, filter_widths[0]), 1.0 / jnp.sqrt(float(C * filter_widths[0]))),
           'l1_bn': bn(),
           'blocks': []}
    for i in range(1, len(filter_widths)):
        K = filter_widths[i]
        raw['blocks'].append({
            'w1': nrm((C, C, 1, K), 1.0 / jnp.sqrt(float(C * K))),
            'bn1': bn(),
            'w_sp': nrm((J,), 1.0 / jnp.sqrt(float(J))),
            'w2': nrm((C, C, 1, 1), 1.0 / jnp.sqrt(float(C))),
            'bn2': bn(),
        })
    cout = num_joints_out * 3
    raw['shrink_w'] = nrm((cout, C * J, 1), 1.0 / jnp.sqrt(float(C * J)))
    raw['shrink_b'] = 0.1 * jax.random.normal(next(keys), (cout,), jnp.float32)
    return raw


# --------------------------------------------------------------------------------------

if __name__ == "__main__":
    num_joints_in = 4
    in_features = 3          # 2D coords + confidence (last feature; unused by V4's blocks)
    num_joints_out = 4
    filter_widths = [3, 3]
    channels = 32            # embed_dim is fixed at 32 in the module
    B = 2

    # receptive field; V4 requires input length == receptive field (final T == 1)
    rf, d = 1, 1
    for K in filter_widths:
        rf += (K - 1) * d
        d *= K
    T = rf                   # = 9

    key = jax.random.PRNGKey(0)
    kx, kp = jax.random.split(key)
    x = jax.random.normal(kx, (B, T, num_joints_in, in_features), jnp.float32)
    x = x.at[..., -1].set(jax.nn.sigmoid(x[..., -1]))   # confidence-like scores

    raw = init_raw_params(kp, num_joints_in, filter_widths, num_joints_out, channels)
    folded, meta = fold_params(raw, filter_widths, num_joints_in, num_joints_out, channels)

    out = jax.block_until_ready(pallas_forward(folded, x, meta))
    ref = jax.block_until_ready(ref_forward(raw, x, filter_widths, num_joints_out))

    assert out.shape == (B, 1, num_joints_out, 3), out.shape
    err = float(jnp.max(jnp.abs(out - ref)))
    assert err < 2e-3, err
    print("KERNEL_OK")
</pallas_src>

<mosaic_0001>
module attributes {stable_mosaic.version = 11 : i64} {
  func.func @_fused_kernel(%arg0: i32, %arg1: memref<1x9x128xf32, #tpu.memory_space<vmem>>, %arg2: memref<128x128xf32, #tpu.memory_space<vmem>>, %arg3: memref<384x128xf32, #tpu.memory_space<vmem>>, %arg4: memref<1x128xf32, #tpu.memory_space<vmem>>, %arg5: memref<384x128xf32, #tpu.memory_space<vmem>>, %arg6: memref<1x128xf32, #tpu.memory_space<vmem>>, %arg7: memref<128x128xf32, #tpu.memory_space<vmem>>, %arg8: memref<1x128xf32, #tpu.memory_space<vmem>>, %arg9: memref<128x128xf32, #tpu.memory_space<vmem>>, %arg10: memref<1x128xf32, #tpu.memory_space<vmem>>, %arg11: memref<1x1x128xf32, #tpu.memory_space<vmem>>) attributes {dimension_semantics = [#tpu.dimension_semantics<parallel>], iteration_bounds = array<i64: 2>, scalar_prefetch = 0 : i64, scratch_operands = 0 : i64, tpu.core_type = #tpu.core_type<tc>, window_params = [{transform_indices = @transform_0, window_bounds = array<i64: 1, 9, 128>}, {pipeline_mode = #tpu.pipeline_mode<synchronous>, transform_indices = @transform_1, window_bounds = array<i64: 128, 128>}, {pipeline_mode = #tpu.pipeline_mode<synchronous>, transform_indices = @transform_2, window_bounds = array<i64: 384, 128>}, {pipeline_mode = #tpu.pipeline_mode<synchronous>, transform_indices = @transform_3, window_bounds = array<i64: 1, 128>}, {pipeline_mode = #tpu.pipeline_mode<synchronous>, transform_indices = @transform_4, window_bounds = array<i64: 384, 128>}, {pipeline_mode = #tpu.pipeline_mode<synchronous>, transform_indices = @transform_5, window_bounds = array<i64: 1, 128>}, {pipeline_mode = #tpu.pipeline_mode<synchronous>, transform_indices = @transform_6, window_bounds = array<i64: 128, 128>}, {pipeline_mode = #tpu.pipeline_mode<synchronous>, transform_indices = @transform_7, window_bounds = array<i64: 1, 128>}, {pipeline_mode = #tpu.pipeline_mode<synchronous>, transform_indices = @transform_8, window_bounds = array<i64: 128, 128>}, {pipeline_mode = #tpu.pipeline_mode<synchronous>, transform_indices = @transform_9, window_bounds = array<i64: 1, 128>}, {transform_indices = @transform_10, window_bounds = array<i64: 1, 1, 128>}]} {
    %c0 = arith.constant 0 : index
    %c0_0 = arith.constant 0 : index
    %c0_1 = arith.constant 0 : index
    %0 = vector.load %arg1[%c0, %c0_0, %c0_1] : memref<1x9x128xf32, #tpu.memory_space<vmem>>, vector<1x9x128xf32>
    %1 = vector.shape_cast %0 : vector<1x9x128xf32> to vector<9x128xf32>
    %c0_2 = arith.constant 0 : index
    %c0_3 = arith.constant 0 : index
    %2 = vector.load %arg2[%c0_2, %c0_3] : memref<128x128xf32, #tpu.memory_space<vmem>>, vector<128x128xf32>
    %cst = arith.constant dense<0.000000e+00> : vector<9x128xf32>
    %3 = tpu.matmul %1, %2, %cst {dimension_numbers = #tpu.dot_dimension_numbers<[1], [0], [0], [1], [0, 0, 1, 1], [], []>} : vector<9x128xf32>, vector<128x128xf32>, vector<9x128xf32> -> vector<9x128xf32>
    %cst_4 = arith.constant 0.000000e+00 : f32
    %4 = vector.broadcast %cst_4 : f32 to vector<9x128xf32>
    %5 = arith.maximumf %3, %4 : vector<9x128xf32>
    %6 = vector.extract_strided_slice %5 {offsets = [0, 0], sizes = [7, 128], strides = [1, 1]} : vector<9x128xf32> to vector<7x128xf32>
    %7 = vector.extract_strided_slice %5 {offsets = [1, 0], sizes = [7, 128], strides = [1, 1]} : vector<9x128xf32> to vector<7x128xf32>
    %8 = vector.extract_strided_slice %5 {offsets = [2, 0], sizes = [7, 128], strides = [1, 1]} : vector<9x128xf32> to vector<7x128xf32>
    %9 = tpu.concatenate %6, %7, %8 in 1 : vector<7x128xf32>, vector<7x128xf32>, vector<7x128xf32> -> vector<7x384xf32>
    %c0_5 = arith.constant 0 : index
    %c0_6 = arith.constant 0 : index
    %10 = vector.load %arg3[%c0_5, %c0_6] : memref<384x128xf32, #tpu.memory_space<vmem>>, vector<384x128xf32>
    %cst_7 = arith.constant dense<0.000000e+00> : vector<7x128xf32>
    %11 = tpu.matmul %9, %10, %cst_7 {dimension_numbers = #tpu.dot_dimension_numbers<[1], [0], [0], [1], [0, 0, 1, 1], [], []>} : vector<7x384xf32>, vector<384x128xf32>, vector<7x128xf32> -> vector<7x128xf32>
    %c0_8 = arith.constant 0 : index
    %c0_9 = arith.constant 0 : index
    %12 = vector.load %arg4[%c0_8, %c0_9] : memref<1x128xf32, #tpu.memory_space<vmem>>, vector<1x128xf32>
    %13 = vector.broadcast %12 : vector<1x128xf32> to vector<7x128xf32>
    %14 = arith.addf %11, %13 : vector<7x128xf32>
    %cst_10 = arith.constant 0.000000e+00 : f32
    %15 = vector.broadcast %cst_10 : f32 to vector<7x128xf32>
    %16 = arith.maximumf %14, %15 : vector<7x128xf32>
    %17 = vector.extract_strided_slice %16 {offsets = [3, 0], sizes = [1, 128], strides = [1, 1]} : vector<7x128xf32> to vector<1x128xf32>
    %18 = vector.extract_strided_slice %16 {offsets = [0, 0], sizes = [1, 128], strides = [1, 1]} : vector<7x128xf32> to vector<1x128xf32>
    %19 = vector.extract_strided_slice %16 {offsets = [3, 0], sizes = [1, 128], strides = [1, 1]} : vector<7x128xf32> to vector<1x128xf32>
    %20 = vector.extract_strided_slice %16 {offsets = [6, 0], sizes = [1, 128], strides = [1, 1]} : vector<7x128xf32> to vector<1x128xf32>
    %21 = tpu.concatenate %18, %19, %20 in 1 : vector<1x128xf32>, vector<1x128xf32>, vector<1x128xf32> -> vector<1x384xf32>
    %c0_11 = arith.constant 0 : index
    %c0_12 = arith.constant 0 : index
    %22 = vector.load %arg5[%c0_11, %c0_12] : memref<384x128xf32, #tpu.memory_space<vmem>>, vector<384x128xf32>
    %cst_13 = arith.constant dense<0.000000e+00> : vector<1x128xf32>
    %23 = tpu.matmul %21, %22, %cst_13 {dimension_numbers = #tpu.dot_dimension_numbers<[1], [0], [0], [1], [0, 0, 1, 1], [], []>} : vector<1x384xf32>, vector<384x128xf32>, vector<1x128xf32> -> vector<1x128xf32>
    %c0_14 = arith.constant 0 : index
    %c0_15 = arith.constant 0 : index
    %24 = vector.load %arg6[%c0_14, %c0_15] : memref<1x128xf32, #tpu.memory_space<vmem>>, vector<1x128xf32>
    %25 = arith.addf %23, %24 : vector<1x128xf32>
    %cst_16 = arith.constant 0.000000e+00 : f32
    %26 = vector.broadcast %cst_16 : f32 to vector<1x128xf32>
    %27 = arith.maximumf %25, %26 : vector<1x128xf32>
    %c0_17 = arith.constant 0 : index
    %c0_18 = arith.constant 0 : index
    %28 = vector.load %arg7[%c0_17, %c0_18] : memref<128x128xf32, #tpu.memory_space<vmem>>, vector<128x128xf32>
    %cst_19 = arith.constant dense<0.000000e+00> : vector<1x128xf32>
    %29 = tpu.matmul %27, %28, %cst_19 {dimension_numbers = #tpu.dot_dimension_numbers<[1], [0], [0], [1], [0, 0, 1, 1], [], []>} : vector<1x128xf32>, vector<128x128xf32>, vector<1x128xf32> -> vector<1x128xf32>
    %c0_20 = arith.constant 0 : index
    %c0_21 = arith.constant 0 : index
    %30 = vector.load %arg8[%c0_20, %c0_21] : memref<1x128xf32, #tpu.memory_space<vmem>>, vector<1x128xf32>
    %31 = arith.addf %29, %30 : vector<1x128xf32>
    %cst_22 = arith.constant 0.000000e+00 : f32
    %32 = vector.broadcast %cst_22 : f32 to vector<1x128xf32>
    %33 = arith.maximumf %31, %32 : vector<1x128xf32>
    %34 = arith.addf %17, %33 : vector<1x128xf32>
    %c0_23 = arith.constant 0 : index
    %c0_24 = arith.constant 0 : index
    %35 = vector.load %arg9[%c0_23, %c0_24] : memref<128x128xf32, #tpu.memory_space<vmem>>, vector<128x128xf32>
    %cst_25 = arith.constant dense<0.000000e+00> : vector<1x128xf32>
    %36 = tpu.matmul %34, %35, %cst_25 {dimension_numbers = #tpu.dot_dimension_numbers<[1], [0], [0], [1], [0, 0, 1, 1], [], []>} : vector<1x128xf32>, vector<128x128xf32>, vector<1x128xf32> -> vector<1x128xf32>
    %c0_26 = arith.constant 0 : index
    %c0_27 = arith.constant 0 : index
    %37 = vector.load %arg10[%c0_26, %c0_27] : memref<1x128xf32, #tpu.memory_space<vmem>>, vector<1x128xf32>
    %38 = arith.addf %36, %37 : vector<1x128xf32>
    %c0_28 = arith.constant 0 : index
    %c0_29 = arith.constant 0 : index
    %c0_30 = arith.constant 0 : index
    %39 = vector.load %arg11[%c0_28, %c0_29, %c0_30] : memref<1x1x128xf32, #tpu.memory_space<vmem>>, vector<1x1x128xf32>
    %40 = vector.shape_cast %39 : vector<1x1x128xf32> to vector<1x128xf32>
    %41 = vector.shape_cast %38 : vector<1x128xf32> to vector<1x1x128xf32>
    tpu.vector_store %arg11[%c0_28, %c0_29, %c0_30], %41 {strides = array<i32>} : memref<1x1x128xf32, #tpu.memory_space<vmem>>, vector<1x1x128xf32>,
    return
  }
  func.func @transform_0(%arg0: i32) -> (i32, i32, i32) {
    %c0_i32 = arith.constant 0 : i32
    %c0_i32_0 = arith.constant 0 : i32
    %c0_i32_1 = arith.constant 0 : i32
    return %arg0, %c0_i32, %c0_i32_0 : i32, i32, i32
  }
  func.func @transform_1(%arg0: i32) -> (i32, i32) {
    %c0_i32 = arith.constant 0 : i32
    %c0_i32_0 = arith.constant 0 : i32
    %c0_i32_1 = arith.constant 0 : i32
    return %c0_i32, %c0_i32_0 : i32, i32
  }
  func.func @transform_2(%arg0: i32) -> (i32, i32) {
    %c0_i32 = arith.constant 0 : i32
    %c0_i32_0 = arith.constant 0 : i32
    %c0_i32_1 = arith.constant 0 : i32
    return %c0_i32, %c0_i32_0 : i32, i32
  }
  func.func @transform_3(%arg0: i32) -> (i32, i32) {
    %c0_i32 = arith.constant 0 : i32
    %c0_i32_0 = arith.constant 0 : i32
    %c0_i32_1 = arith.constant 0 : i32
    return %c0_i32, %c0_i32_0 : i32, i32
  }
  func.func @transform_4(%arg0: i32) -> (i32, i32) {
    %c0_i32 = arith.constant 0 : i32
    %c0_i32_0 = arith.constant 0 : i32
    %c0_i32_1 = arith.constant 0 : i32
    return %c0_i32, %c0_i32_0 : i32, i32
  }
  func.func @transform_5(%arg0: i32) -> (i32, i32) {
    %c0_i32 = arith.constant 0 : i32
    %c0_i32_0 = arith.constant 0 : i32
    %c0_i32_1 = arith.constant 0 : i32
    return %c0_i32, %c0_i32_0 : i32, i32
  }
  func.func @transform_6(%arg0: i32) -> (i32, i32) {
    %c0_i32 = arith.constant 0 : i32
    %c0_i32_0 = arith.constant 0 : i32
    %c0_i32_1 = arith.constant 0 : i32
    return %c0_i32, %c0_i32_0 : i32, i32
  }
  func.func @transform_7(%arg0: i32) -> (i32, i32) {
    %c0_i32 = arith.constant 0 : i32
    %c0_i32_0 = arith.constant 0 : i32
    %c0_i32_1 = arith.constant 0 : i32
    return %c0_i32, %c0_i32_0 : i32, i32
  }
  func.func @transform_8(%arg0: i32) -> (i32, i32) {
    %c0_i32 = arith.constant 0 : i32
    %c0_i32_0 = arith.constant 0 : i32
    %c0_i32_1 = arith.constant 0 : i32
    return %c0_i32, %c0_i32_0 : i32, i32
  }
  func.func @transform_9(%arg0: i32) -> (i32, i32) {
    %c0_i32 = arith.constant 0 : i32
    %c0_i32_0 = arith.constant 0 : i32
    %c0_i32_1 = arith.constant 0 : i32
    return %c0_i32, %c0_i32_0 : i32, i32
  }
  func.func @transform_10(%arg0: i32) -> (i32, i32, i32) {
    %c0_i32 = arith.constant 0 : i32
    %c0_i32_0 = arith.constant 0 : i32
    %c0_i32_1 = arith.constant 0 : i32
    return %arg0, %c0_i32, %c0_i32_0 : i32, i32, i32
  }
}

</mosaic_0001>

<bundles_post_ra>
// kernel: tpu_custom_call.1
= control target key start
LH: loop header
LB: loop body
LE: loop exit
PB: predicated region body
PF: predicated region fallthrough
CT: control target
= control target key end

     0   :  { %s2211_s0 = inlined_call_operand.vmem [shape: f32[2,9,128], index: 0, kind: input, shape index: {}]   ;;  %s2212_s1 = inlined_call_operand.hbm [shape: f32[128,128], index: 1, kind: input, shape index: {}]   ;;  %s2213_s2 = inlined_call_operand.hbm [shape: f32[384,128], index: 2, kind: input, shape index: {}]   ;;  %s2214_s3 = inlined_call_operand.vmem [shape: f32[1,128], index: 3, kind: input, shape index: {}]   ;;  %s2215_s4 = inlined_call_operand.hbm [shape: f32[384,128], index: 4, kind: input, shape index: {}]   ;;  %s2216_s5 = inlined_call_operand.vmem [shape: f32[1,128], index: 5, kind: input, shape index: {}]   ;;  %s2217_s6 = inlined_call_operand.hbm [shape: f32[128,128], index: 6, kind: input, shape index: {}]   ;;  %s2218_s7 = inlined_call_operand.vmem [shape: f32[1,128], index: 7, kind: input, shape index: {}]   ;;  %s2219_s8 = inlined_call_operand.hbm [shape: f32[128,128], index: 8, kind: input, shape index: {}]   ;;  %s2220_s9 = inlined_call_operand.vmem [shape: f32[1,128], index: 9, kind: input, shape index: {}]   ;;  %s2221_s10 = inlined_call_operand.hbm [shape: f32[2,1,128], index: 10, kind: output, shape index: {}]  }
   0x1   :  { %2224 = sst [smem:[#allocation18_spill]] %s2213_s2 }
   0x2   :  { %15 = vsyncpa [#allocation3], 0 }
   0x3   :  { %16 = vsyncpa [#allocation6], 0 }
   0x4   :  { %17 = vsyncpa [#allocation9], 0 }
   0x5   :  { %18 = vsyncpa [#allocation4], 0 }
   0x6   :  { %20 = vsyncpa [#allocation4 + $0x1], 0  ;;  %s1941_s13 = smov 0   ;;  %s1943_s14 = smov 0  }
   0x7   :  { %s1945_s15 = smov 0   ;;  %s1947_s16 = smov 0  }
   0x8 LB: > { %2225 = sst [smem:[#allocation16_spill]] %s1870_s15  ;;  %s1962_s17 = sadd.s32 4294967295, %s1874_s16   ;;  %s1874_s16 = sphi %s1947_s16, %s2243_s16   ;;  %s1870_s15 = sphi %s1945_s15, %s2240_s15   ;;  %s1866_s14 = sphi %s1943_s14, %s2242_s14   ;;  %s1862_s13 = sphi %s1941_s13, %s2241_s13  }
   0x9   : > { %s1226_s18 = sadd.s32 4294967294, %s1874_s16   ;;  %s1966_s19 = sadd.s32 1, %s1874_s16  }
   0xa   : > { %s248_s20 = sadd.s32 1, %s1870_s15  ;;  %s245_s21 = ssub.s32 %s1874_s16, %s1966_s19 }
   0xb   : > { %p258_p0 = scmp.ne.s32.totalorder %s1870_s15, %s1866_s14  ;;  %p246_p1 = scmp.eq.s32.totalorder %s245_s21, 0 }
   0xc   : > { %p259_p2 = scmp.eq.s32.totalorder %s1962_s17, 1  ;;  %p264_p3 = scmp.ne.s32.totalorder %s1866_s14, %s1862_s13 }
   0xd   : > { %p265_p4 = scmp.eq.s32.totalorder %s1226_s18, 1  ;;  %p1227_p7 = scmp.ge.s32.totalorder %s1874_s16, 1 }
   0xe   : > { %s1977_s22 = scalar_select %p246_p1, %s1870_s15, %s248_s20  }
   0xf   : > { %p1979_p5 = por %p259_p2, %p258_p0  ;;  %p1983_p6 = por %p265_p4, %p264_p3 }
  0x10   : > { %2226 = sst [smem:[#allocation17_spill]] %s1977_s22  ;;  %p272_p8 = scmp.lt.s32.totalorder %s1874_s16, 3 }
  0x11   : > { %p2223_p9 = scmp.eq.s32.totalorder %s1962_s17, 0  ;;  %s1876_s26 = smov [#allocation5]  }
  0x12   : > { %p1990_p10 = pnand %p1227_p7, %p272_p8  ;;  %s297_s27 = sshll.u32 %s1876_s26, 4  ;;  %s298_s27 = int_to_ptr.vmem [resolvable:$true] %s297_s27 }
  0x13   : > { %s1877_s29 = smov [#allocation8]   ;;  %s1878_s11 = smov [#allocation2]  }
  0x14   : > { %p1600_p11 = pneg %p1990_p10  ;;  %s329_s30 = sshll.u32 %s1877_s29, 4  ;;  %s330_s30 = int_to_ptr.vmem [resolvable:$true] %s329_s30 }
  0x15   : > { %s284_s12 = sshll.u32 %s1878_s11, 4  ;;  %s1683_s20 = scalar_lea.vmem %s298_s27, 6144  ;;  %s285_s12 = int_to_ptr.vmem [resolvable:$true] %s284_s12 }
  0x16   : > { %p1998_p12 = pnand %p2223_p9, %p1600_p11  ;;  %p1684_p0 = scmp.ne.s32.totalorder %s298_s27, %s1683_s20 }
  0x17   : > { %p1691_p3 = scmp.lt.s32.totalorder %s298_s27, %s298_s27  ;;  %p1692_p4 = scmp.lt.s32.totalorder %s1683_s20, %s1683_s20 }
  0x18   : > { %p2004_p13 = pneg %p1998_p12 }
  0x19   : > { %p1693_p7 = por %p1692_p4, %p1691_p3 }
  0x1a   : > { %p1686_p1 = pnand %p1684_p0, %p2004_p13 }
  0x1c   : > { %p1687_p2 = pneg %p1686_p1 }
  0x1e   : > { %p1694_p8 = pnand %p1693_p7, %p1687_p2 }
  0x20   : > { %1697 = shalt.err (!%p1694_p8)
}
  0x21   : > { %s1879_s21 = smov 128   ;;  %s1880_s26 = smov 8  }
  0x22   : > { %s2232_s2 = sld [smem:[#allocation18_spill]]  ;;  %s1709_s22 = scalar_lea.vmem %s330_s30, 2048 }
  0x23   : > { %p1710_p11 = scmp.ne.s32.totalorder %s330_s30, %s1709_s22  ;;  %p1717_p3 = scmp.lt.s32.totalorder %s330_s30, %s330_s30 }
  0x24   : > { %p1718_p2 = scmp.lt.s32.totalorder %s1709_s22, %s1709_s22 }
  0x25   : > { %p1712_p0 = pnand %p1710_p11, %p2004_p13 }
  0x26   : > { %p1719_p4 = por %p1718_p2, %p1717_p3 }
  0x27   : > { %p1713_p1 = pneg %p1712_p0 }
  0x28   : > { %1606 = dma.hbm_to_vmem [thread:$0]  (!%p1998_p12), %s2232_s2, 6144, %s298_s27, [#allocation6], %s1879_s21, %s1879_s21, %s1880_s26  }
  0x29   : > { %p1720_p7 = pnand %p1719_p4, %p1713_p1 }
  0x2b   : > { %1723 = shalt.err (!%p1720_p7)
}
  0x2c   : > { %1612 = dma.hbm_to_vmem [thread:$0]  (!%p1998_p12), %s2217_s6, 2048, %s330_s30, [#allocation9], %s1879_s21, %s1879_s21, %s1880_s26  }
  0x2d   : > { %s1735_s27 = scalar_lea.vmem %s285_s12, 2048  ;;  %p1743_p9 = scmp.lt.s32.totalorder %s285_s12, %s285_s12 }
  0x2e   : > { %p1736_p8 = scmp.ne.s32.totalorder %s285_s12, %s1735_s27  ;;  %p1744_p3 = scmp.lt.s32.totalorder %s1735_s27, %s1735_s27 }
  0x30   : > { %p1738_p11 = pnand %p1736_p8, %p2004_p13  ;;  %p1745_p1 = por %p1744_p3, %p1743_p9 }
  0x32   : > { %p1739_p0 = pneg %p1738_p11 }
  0x34   : > { %p1746_p2 = pnand %p1745_p1, %p1739_p0 }
  0x36   : > { %1749 = shalt.err (!%p1746_p2)
}
  0x37   : > { %1603 = dma.hbm_to_vmem [thread:$0]  (!%p1998_p12), %s2212_s1, 2048, %s285_s12, [#allocation3], %s1879_s21, %s1879_s21, %s1880_s26  }
  0x38   : > { %s1881_s30 = smov [#allocation7]   ;;  %s1882_s11 = smov [#allocation10]  }
  0x39   : > { %s313_s29 = sshll.u32 %s1881_s30, 4  ;;  %s345_s20 = sshll.u32 %s1882_s11, 4  ;;  %s314_s29 = int_to_ptr.vmem [resolvable:$true] %s313_s29  ;;  %s346_s20 = int_to_ptr.vmem [resolvable:$true] %s345_s20 }
  0x3a   : > { %s1761_s2 = scalar_lea.vmem %s314_s29, 6144  ;;  %p1769_p8 = scmp.lt.s32.totalorder %s314_s29, %s314_s29 }
  0x3b   : > { %p1762_p4 = scmp.ne.s32.totalorder %s314_s29, %s1761_s2  ;;  %p1770_p11 = scmp.lt.s32.totalorder %s1761_s2, %s1761_s2 }
  0x3d   : > { %p1764_p9 = pnand %p1762_p4, %p2004_p13  ;;  %p1771_p0 = por %p1770_p11, %p1769_p8 }
  0x3f   : > { %p1765_p7 = pneg %p1764_p9 }
  0x41   : > { %p1772_p3 = pnand %p1771_p0, %p1765_p7 }
  0x43   : > { %1775 = shalt.err (!%p1772_p3)
}
  0x44   : > { %1609 = dma.hbm_to_vmem [thread:$0]  (!%p1998_p12), %s2215_s4, 6144, %s314_s29, [#allocation6], %s1879_s21, %s1879_s21, %s1880_s26  }
  0x45   : > { %s1787_s22 = scalar_lea.vmem %s346_s20, 2048  ;;  %p1795_p9 = scmp.lt.s32.totalorder %s346_s20, %s346_s20 }
  0x46   : > { %p1788_p1 = scmp.ne.s32.totalorder %s346_s20, %s1787_s22  ;;  %p1796_p8 = scmp.lt.s32.totalorder %s1787_s22, %s1787_s22 }
  0x48   : > { %p1790_p2 = pnand %p1788_p1, %p2004_p13  ;;  %p1797_p7 = por %p1796_p8, %p1795_p9 }
  0x4a   : > { %p1791_p4 = pneg %p1790_p2 }
  0x4c   : > { %p1798_p11 = pnand %p1797_p7, %p1791_p4 }
  0x4e   : > { %1801 = shalt.err (!%p1798_p11)
}
  0x4f   : > { %1615 = dma.hbm_to_vmem [thread:$0]  (!%p1998_p12), %s2219_s8, 2048, %s346_s20, [#allocation9], %s1879_s21, %s1879_s21, %s1880_s26  }
  0x50   : > { %372 = sbr.rel (%p1990_p10) target bundleno = 1146 (0x47a), region = 60  ;;  %p2233_p13 = scmp.eq.s32.totalorder (!%p1990_p10), %s1962_s17, 0 }
  0x55   : > { %1845 = dma.done.wait (%p2233_p13), [#allocation3], 2048   ;;  %p2234_p0 = pmov %p2233_p13 }
  0x57   : > { %1847 = vsyncadd (%p2234_p0), [#allocation3], 4294965248  ;;  %p2235_p3 = pmov %p2234_p0 }
  0x58   : > { %p2236_p1 = pmov %p2234_p0 }
  0x59   : > { %1849 = dma.done.wait (%p2235_p3), [#allocation6], 12288  }
  0x5a   : > { %1851 = vsyncadd (%p2236_p1), [#allocation6], 4294955008  ;;  %p2237_p2 = pmov %p2234_p0 }
  0x5b   : > { %p2238_p12 = pmov %p2234_p0 }
  0x5c   : > { %1853 = dma.done.wait (%p2237_p2), [#allocation9], 4096  }
  0x5d   : > { %1855 = vsyncadd (%p2238_p12), [#allocation9], 4294963200  ;;  %p425_p10 = scmp.lt.s32.totalorder %s1962_s17, 1  ;;  %v447_v0 = vld [vmem:[#allocation2 + $0x78] sm:$0xff]  ;;  %v446_v1 = vld [vmem:[#allocation2 + $0x70] sm:$0xff]  ;;  %v1883_v43 = vmov 0.0  }
  0x5e   : > { %1403 = vmatprep.subr.mxu0 %v447_v0  ;;  %v445_v2 = vld [vmem:[#allocation2 + $0x68] sm:$0xff]  ;;  %v444_v3 = vld [vmem:[#allocation2 + $0x60] sm:$0xff]  ;;  %v443_v5 = vld [vmem:[#allocation2 + $0x58] sm:$0xff]  ;;  %vm1884_vm0 = vmmov 0   ;;  %vm529_vm1 = vcmask 1045504   ;;  %s423_s22 = sand.u32 1, %s1866_s14  }
  0x5f   : > { %s426_s25 = scalar_select %p425_p10, %s1962_s17, 1  ;;  %1404 = vmatpush3.msra.mxu0 %v447_v0  ;;  %v565_v6 = vld [vmem:[#allocation5 + $0xf8] sm:$0xff]  ;;  %v564_v8 = vld [vmem:[#allocation5 + $0xf0] sm:$0xff]  ;;  %v563_v11 = vld [vmem:[#allocation5 + $0xe8] sm:$0xff] }
  0x60   : > { %1405 = vmatprep.subr.mxu0 %v446_v1  ;;  %v549_v7 = vld [vmem:[#allocation5 + $0x78] sm:$0xff]  ;;  %1265 = vmatprep.subr.mxu1 %v565_v6  ;;  %v548_v9 = vld [vmem:[#allocation5 + $0x70] sm:$0xff]  ;;  %v547_v12 = vld [vmem:[#allocation5 + $0x68] sm:$0xff]  ;;  %s1109_s29 = scalar_lea.sflag [#allocation4], %s423_s22  ;;  %s1885_s20 = smov [#allocation11]  }
  0x61   : > { %s1246_s28 = sshll.u32 %s426_s25, 4  ;;  %1406 = vmatpush3.msra.mxu0 %v446_v1  ;;  %v442_v10 = vld [vmem:[#allocation2 + $0x50] sm:$0xff]  ;;  %1266 = vmatpush3.msra.mxu1 %v549_v7  ;;  %v441_v13 = vld [vmem:[#allocation2 + $0x48] sm:$0xff]  ;;  %v562_v14 = vld [vmem:[#allocation5 + $0xe0] sm:$0xff]  ;;  %s1243_s25 = sshll.u32 %s1962_s17, 4 }
  0x62   : > { %s2077_s26 = scalar_lea.vmem %s2211_s0, %s1246_s28  ;;  %1407 = vmatprep.subr.mxu0 %v445_v2  ;;  %1267 = vmatprep.subr.mxu1 %v564_v8  ;;  %v546_v15 = vld [vmem:[#allocation5 + $0x60] sm:$0xff]  ;;  %v561_v17 = vld [vmem:[#allocation5 + $0xd8] sm:$0xff]  ;;  %v560_v20 = vld [vmem:[#allocation5 + $0xd0] sm:$0xff]  ;;  %s424_s28 = scalar_lea.vmem [#allocation11], %s423_s22 }
  0x63   : > { %v430_v4 = vld [vmem:[%s2077_s26] sm:$0xff]  ;;  %1408 = vmatpush3.msra.mxu0 %v445_v2  ;;  %1268 = vmatpush3.msra.mxu1 %v548_v9  ;;  %v545_v18 = vld [vmem:[#allocation5 + $0x58] sm:$0xff]  ;;  %v544_v21 = vld [vmem:[#allocation5 + $0x50] sm:$0xff]  ;;  %s1121_s18 = sshll.u32 %s424_s28, 4  ;;  %s2176_s30 = scalar_lea.hbm %s2221_s10, %s1243_s25  ;;  %s1122_s18 = int_to_ptr.vmem [resolvable:$true] %s1121_s18 }
  0x64   : > { %1435 = vmatprep.mubr.f32.mxu0 %v430_v4  ;;  %1409 = vmatprep.subr.mxu0 %v444_v3  ;;  %v440_v16 = vld [vmem:[#allocation2 + $0x40] sm:$0xff]  ;;  %v439_v19 = vld [vmem:[#allocation2 + $0x38] sm:$0xff]  ;;  %v438_v22 = vld [vmem:[#allocation2 + $0x30] sm:$0xff]  ;;  %s1802_s11 = scalar_lea.vmem %s1122_s18, 16  ;;  %s1806_s17 = sshll.u32 %s1885_s20, 4  ;;  %s1807_s17 = int_to_ptr.vmem [resolvable:$false] %s1806_s17 }
  0x65   : > { %1410 = vmatpush3.msra.mxu0 %v444_v3  ;;  %1269 = vmatprep.subr.mxu1 %v563_v11  ;;  %v559_v23 = vld [vmem:[#allocation5 + $0xc8] sm:$0xff]  ;;  %v558_v26 = vld [vmem:[#allocation5 + $0xc0] sm:$0xff]  ;;  %v557_v29 = vld [vmem:[#allocation5 + $0xb8] sm:$0xff]  ;;  %p1803_p4 = scmp.ne.s32.totalorder %s1122_s18, %s1802_s11  ;;  %s1808_s12 = scalar_lea.vmem %s1807_s17, 32 }
  0x66   : > { %1411 = vmatprep.subr.mxu0 %v443_v5  ;;  %1270 = vmatpush3.msra.mxu1 %v547_v12  ;;  %v543_v24 = vld [vmem:[#allocation5 + $0x48] sm:$0xff]  ;;  %v542_v27 = vld [vmem:[#allocation5 + $0x40] sm:$0xff]  ;;  %v541_v30 = vld [vmem:[#allocation5 + $0x38] sm:$0xff]  ;;  %p1809_p7 = scmp.lt.s32.totalorder %s1122_s18, %s1807_s17  ;;  %p1810_p11 = scmp.lt.s32.totalorder %s1808_s12, %s1802_s11 }
  0x67   : > { %1412 = vmatpush3.msra.mxu0 %v443_v5  ;;  %1271 = vmatprep.subr.mxu1 %v562_v14  ;;  %v437_v25 = vld [vmem:[#allocation2 + $0x28] sm:$0xff]  ;;  %v436_v28 = vld [vmem:[#allocation2 + $0x20] sm:$0xff]  ;;  %v435_v31 = vld [vmem:[#allocation2 + $0x18] sm:$0xff]  ;;  %p1804_p9 = pnand %p1803_p4, %p1979_p5 }
  0x68   : > { %1413 = vmatprep.subr.mxu0 %v442_v10  ;;  %1272 = vmatpush3.msra.mxu1 %v546_v15  ;;  %v556_v32 = vld [vmem:[#allocation5 + $0xb0] sm:$0xff]  ;;  %v555_v35 = vld [vmem:[#allocation5 + $0xa8] sm:$0xff]  ;;  %v554_v38 = vld [vmem:[#allocation5 + $0xa0] sm:$0xff]  ;;  %p1811_p13 = por %p1810_p11, %p1809_p7 }
  0x69   : > { %1414 = vmatpush3.msra.mxu0 %v442_v10  ;;  %1273 = vmatprep.subr.mxu1 %v561_v17  ;;  %v540_v33 = vld [vmem:[#allocation5 + $0x30] sm:$0xff]  ;;  %v539_v36 = vld [vmem:[#allocation5 + $0x28] sm:$0xff]  ;;  %v538_v39 = vld [vmem:[#allocation5 + $0x20] sm:$0xff]  ;;  %p1805_p8 = pneg %p1804_p9 }
  0x6a   : > { %1415 = vmatprep.subr.mxu0 %v441_v13  ;;  %1274 = vmatpush3.msra.mxu1 %v545_v18  ;;  %v434_v34 = vld [vmem:[#allocation2 + $0x10] sm:$0xff]  ;;  %v433_v37 = vld [vmem:[#allocation2 + $0x8] sm:$0xff]  ;;  %v432_v40 = vld [vmem:[#allocation2] sm:$0xff] }
  0x6b   : > { %1416 = vmatpush3.msra.mxu0 %v441_v13  ;;  %1275 = vmatprep.subr.mxu1 %v560_v20  ;;  %v431_v41 = vld [vmem:[%s2077_s26 + $0x8] sm:$0x1]  ;;  %v581_v42 = vld [vmem:[#allocation5 + $0x178] sm:$0xff]  ;;  %v580_v44 = vld [vmem:[#allocation5 + $0x170] sm:$0xff]  ;;  %p1812_p0 = pnand %p1811_p13, %p1805_p8 }
  0x6c   : > { %1417 = vmatprep.subr.mxu0 %v440_v16  ;;  %1276 = vmatpush3.msra.mxu1 %v544_v21  ;;  %v579_v45 = vld [vmem:[#allocation5 + $0x168] sm:$0xff]  ;;  %v578_v46 = vld [vmem:[#allocation5 + $0x160] sm:$0xff]  ;;  %v577_v47 = vld [vmem:[#allocation5 + $0x158] sm:$0xff] }
  0x6d   : > { %1418 = vmatpush3.msra.mxu0 %v440_v16  ;;  %1277 = vmatprep.subr.mxu1 %v559_v23  ;;  %v576_v48 = vld [vmem:[#allocation5 + $0x150] sm:$0xff]  ;;  %v575_v49 = vld [vmem:[#allocation5 + $0x148] sm:$0xff]  ;;  %v574_v50 = vld [vmem:[#allocation5 + $0x140] sm:$0xff] }
  0x6e   : > { %1419 = vmatprep.subr.mxu0 %v439_v19  ;;  %1278 = vmatpush3.msra.mxu1 %v543_v24  ;;  %v573_v51 = vld [vmem:[#allocation5 + $0x138] sm:$0xff]  ;;  %v572_v52 = vld [vmem:[#allocation5 + $0x130] sm:$0xff]  ;;  %v571_v53 = vld [vmem:[#allocation5 + $0x128] sm:$0xff] }
  0x6f   : > { %1420 = vmatpush3.msra.mxu0 %v439_v19  ;;  %1279 = vmatprep.subr.mxu1 %v558_v26  ;;  %v570_v54 = vld [vmem:[#allocation5 + $0x120] sm:$0xff]  ;;  %v553_v55 = vld [vmem:[#allocation5 + $0x98] sm:$0xff]  ;;  %v552_v58 = vld [vmem:[#allocation5 + $0x90] sm:$0xff] }
  0x70   : > { %1421 = vmatprep.subr.mxu0 %v438_v22  ;;  %1280 = vmatpush3.msra.mxu1 %v542_v27  ;;  %v537_v56 = vld [vmem:[#allocation5 + $0x18] sm:$0xff]  ;;  %v536_v59 = vld [vmem:[#allocation5 + $0x10] sm:$0xff]  ;;  %v551_v61 = vld [vmem:[#allocation5 + $0x88] sm:$0xff] }
  0x71   : > { %1422 = vmatpush3.msra.mxu0 %v438_v22  ;;  %1281 = vmatprep.subr.mxu1 %v557_v29  ;;  %v569_v57 = vld [vmem:[#allocation5 + $0x118] sm:$0xff]  ;;  %v568_v60 = vld [vmem:[#allocation5 + $0x110] sm:$0xff]  ;;  %v535_v62 = vld [vmem:[#allocation5 + $0x8] sm:$0xff] }
  0x72   : > { %1423 = vmatprep.subr.mxu0 %v437_v25  ;;  %1282 = vmatpush3.msra.mxu1 %v541_v30  ;;  %v567_v63 = vld [vmem:[#allocation5 + $0x108] sm:$0xff]  ;;  %v550_v0 = vld [vmem:[#allocation5 + $0x80] sm:$0xff]  ;;  %v766_v3 = vld [vmem:[#allocation7 + $0xf8] sm:$0xff] }
  0x73   : > { %1424 = vmatpush3.msra.mxu0 %v437_v25  ;;  %1283 = vmatprep.subr.mxu1 %v556_v32  ;;  %v534_v1 = vld [vmem:[#allocation5] sm:$0xff]  ;;  %v782_v11 = vld [vmem:[#allocation7 + $0x178] sm:$0xff]  ;;  %v765_v14 = vld [vmem:[#allocation7 + $0xf0] sm:$0xff] }
  0x74   : > { %1425 = vmatprep.subr.mxu0 %v436_v28  ;;  %1284 = vmatpush3.msra.mxu1 %v540_v33  ;;  %v566_v2 = vld [vmem:[#allocation5 + $0x100] sm:$0xff]  ;;  %v750_v12 = vld [vmem:[#allocation7 + $0x78] sm:$0xff]  ;;  %v781_v15 = vld [vmem:[#allocation7 + $0x170] sm:$0xff] }
  0x75   : > { %1426 = vmatpush3.msra.mxu0 %v436_v28  ;;  %1285 = vmatprep.subr.mxu1 %v555_v35  ;;  %v749_v16 = vld [vmem:[#allocation7 + $0x70] sm:$0xff]  ;;  %v764_v17 = vld [vmem:[#allocation7 + $0xe8] sm:$0xff]  ;;  %v763_v20 = vld [vmem:[#allocation7 + $0xe0] sm:$0xff] }
  0x76   : > { %1427 = vmatprep.subr.mxu0 %v435_v31  ;;  %1286 = vmatpush3.msra.mxu1 %v539_v36  ;;  %v780_v18 = vld [vmem:[#allocation7 + $0x168] sm:$0xff]  ;;  %v779_v21 = vld [vmem:[#allocation7 + $0x160] sm:$0xff]  ;;  %v762_v23 = vld [vmem:[#allocation7 + $0xd8] sm:$0xff] }
  0x77   : > { %1428 = vmatpush3.msra.mxu0 %v435_v31  ;;  %1287 = vmatprep.subr.mxu1 %v554_v38  ;;  %v748_v19 = vld [vmem:[#allocation7 + $0x68] sm:$0xff]  ;;  %v747_v22 = vld [vmem:[#allocation7 + $0x60] sm:$0xff]  ;;  %v778_v24 = vld [vmem:[#allocation7 + $0x158] sm:$0xff] }
  0x78   : > { %1429 = vmatprep.subr.mxu0 %v434_v34  ;;  %1288 = vmatpush3.msra.mxu1 %v538_v39  ;;  %v746_v25 = vld [vmem:[#allocation7 + $0x58] sm:$0xff]  ;;  %v761_v26 = vld [vmem:[#allocation7 + $0xd0] sm:$0xff]  ;;  %v760_v29 = vld [vmem:[#allocation7 + $0xc8] sm:$0xff] }
  0x79   : > { %1430 = vmatpush3.msra.mxu0 %v434_v34  ;;  %1289 = vmatprep.subr.mxu1 %v553_v55  ;;  %v777_v27 = vld [vmem:[#allocation7 + $0x150] sm:$0xff]  ;;  %v776_v30 = vld [vmem:[#allocation7 + $0x148] sm:$0xff]  ;;  %v759_v32 = vld [vmem:[#allocation7 + $0xc0] sm:$0xff] }
  0x7a   : > { %1431 = vmatprep.subr.mxu0 %v433_v37  ;;  %1290 = vmatpush3.msra.mxu1 %v537_v56  ;;  %v745_v28 = vld [vmem:[#allocation7 + $0x50] sm:$0xff]  ;;  %v744_v31 = vld [vmem:[#allocation7 + $0x48] sm:$0xff]  ;;  %v775_v33 = vld [vmem:[#allocation7 + $0x140] sm:$0xff] }
  0x7b   : > { %1432 = vmatpush3.msra.mxu0 %v433_v37  ;;  %1291 = vmatprep.subr.mxu1 %v552_v58  ;;  %v743_v34 = vld [vmem:[#allocation7 + $0x40] sm:$0xff]  ;;  %v758_v35 = vld [vmem:[#allocation7 + $0xb8] sm:$0xff]  ;;  %v757_v38 = vld [vmem:[#allocation7 + $0xb0] sm:$0xff] }
  0x7c   : > { %1433 = vmatprep.subr.mxu0 %v432_v40  ;;  %1292 = vmatpush3.msra.mxu1 %v536_v59  ;;  %v774_v36 = vld [vmem:[#allocation7 + $0x138] sm:$0xff]  ;;  %v773_v39 = vld [vmem:[#allocation7 + $0x130] sm:$0xff]  ;;  %v768_v55 = vld [vmem:[#allocation7 + $0x108] sm:$0xff] }
  0x7d   : > { %1434 = vmatpush3.msra.mxu0 %v432_v40  ;;  %1293 = vmatprep.subr.mxu1 %v551_v61  ;;  %v742_v37 = vld [vmem:[#allocation7 + $0x38] sm:$0xff]  ;;  %v741_v40 = vld [vmem:[#allocation7 + $0x30] sm:$0xff]  ;;  %v736_v56 = vld [vmem:[#allocation7 + $0x8] sm:$0xff] }
  0x7e   : > { %1436 = vmatmul.mubr.f32.vlgmr.msra.gmra.mxu0 %v431_v41  ;;  %1438 = vmatprep.subr.mxu0 %v1883_v43  ;;  %v756_v41 = vld [vmem:[#allocation7 + $0xa8] sm:$0xff]  ;;  %v767_v58 = vld [vmem:[#allocation7 + $0x100] sm:$0xff] }
  0x7f   : > { %1439 = vmatpush3.msra.mxu0 %v581_v42  ;;  %1294 = vmatpush3.msra.mxu1 %v535_v62  ;;  %v772_v42 = vld [vmem:[#allocation7 + $0x128] sm:$0xff]  ;;  %v735_v59 = vld [vmem:[#allocation7] sm:$0xff] }
  0x80   : > { %1440 = vmatprep.subr.mxu0 %v1883_v43  ;;  %1295 = vmatprep.subr.mxu1 %v550_v0  ;;  %v1242_v62 = vld [vmem:[%s2214_s3] ss:$0 sm:$0xff] }
  0x81   : > { %1441 = vmatpush3.msra.mxu0 %v580_v44  ;;  %1296 = vmatpush3.msra.mxu1 %v534_v1  ;;  %v740_v44 = vld [vmem:[#allocation7 + $0x28] sm:$0xff] }
  0x82   : > { %1442 = vmatprep.subr.mxu0 %v1883_v43  ;;  %1470 = vmatprep.mubr.msk.f32.mxu0 %vm1884_vm0, %v1883_v43 }
  0x83   : > { %1443 = vmatpush3.msra.mxu0 %v579_v45  ;;  %1317 = vmatprep.subr.mxu1 %v766_v3  ;;  %v755_v45 = vld [vmem:[#allocation7 + $0xa0] sm:$0xff] }
  0x84   : > { %1444 = vmatprep.subr.mxu0 %v1883_v43 }
  0x85   : > { %1445 = vmatpush3.msra.mxu0 %v578_v46  ;;  %v771_v46 = vld [vmem:[#allocation7 + $0x120] sm:$0xff] }
  0x86   : > { %1446 = vmatprep.subr.mxu0 %v1883_v43 }
  0x87   : > { %1447 = vmatpush3.msra.mxu0 %v577_v47  ;;  %v739_v47 = vld [vmem:[#allocation7 + $0x20] sm:$0xff] }
  0x88   : > { %1448 = vmatprep.subr.mxu0 %v1883_v43 }
  0x89   : > { %1449 = vmatpush3.msra.mxu0 %v576_v48  ;;  %v754_v48 = vld [vmem:[#allocation7 + $0x98] sm:$0xff] }
  0x8a   : > { %1450 = vmatprep.subr.mxu0 %v1883_v43 }
  0x8b   : > { %1451 = vmatpush3.msra.mxu0 %v575_v49  ;;  %v770_v49 = vld [vmem:[#allocation7 + $0x118] sm:$0xff] }
  0x8c   : > { %1452 = vmatprep.subr.mxu0 %v1883_v43 }
  0x8d   : > { %1453 = vmatpush3.msra.mxu0 %v574_v50  ;;  %v738_v50 = vld [vmem:[#allocation7 + $0x18] sm:$0xff] }
  0x8e   : > { %1454 = vmatprep.subr.mxu0 %v1883_v43 }
  0x8f   : > { %1455 = vmatpush3.msra.mxu0 %v573_v51  ;;  %v753_v51 = vld [vmem:[#allocation7 + $0x90] sm:$0xff] }
  0x90   : > { %1456 = vmatprep.subr.mxu0 %v1883_v43 }
  0x91   : > { %1457 = vmatpush3.msra.mxu0 %v572_v52  ;;  %v769_v52 = vld [vmem:[#allocation7 + $0x110] sm:$0xff] }
  0x92   : > { %1458 = vmatprep.subr.mxu0 %v1883_v43 }
  0x93   : > { %1459 = vmatpush3.msra.mxu0 %v571_v53  ;;  %v737_v53 = vld [vmem:[#allocation7 + $0x10] sm:$0xff] }
  0x94   : > { %1460 = vmatprep.subr.mxu0 %v1883_v43 }
  0x95   : > { %1461 = vmatpush3.msra.mxu0 %v570_v54  ;;  %v752_v54 = vld [vmem:[#allocation7 + $0x88] sm:$0xff] }
  0x96   : > { %1462 = vmatprep.subr.mxu0 %v1883_v43 }
  0x97   : > { %1463 = vmatpush3.msra.mxu0 %v569_v57  ;;  %v751_v57 = vld [vmem:[#allocation7 + $0x80] sm:$0xff] }
  0x98   : > { %1464 = vmatprep.subr.mxu0 %v1883_v43 }
  0x99   : > { %1465 = vmatpush3.msra.mxu0 %v568_v60 }
  0x9a   : > { %1466 = vmatprep.subr.mxu0 %v1883_v43 }
  0x9b   : > { %1467 = vmatpush3.msra.mxu0 %v567_v63 }
  0x9c   : > { %1468 = vmatprep.subr.mxu0 %v1883_v43 }
  0x9d   : > { %1469 = vmatpush3.msra.mxu0 %v566_v2 }
  0x9e   : > { %1473 = vmatprep.subr.mxu0 %v1883_v43 }
 0x13e   : > { %v1437_v4 = vpop.f32.mrf.mxu0 }
 0x13f   : > { %v524_v5 = vmax.f32 %v1437_v4, 0.0 }
 0x140   : > { %v514_v6 = vpop.f32.mrf.mxu0 }
 0x141   : > { %v523_v7 = vmax.f32 %v514_v6, 0.0  ;;  %v531_v8 = vrot.slane %v524_v5, 2 }
 0x143   : > { %v530_v9 = vrot.slane %v523_v7, 2  ;;  %v526_v10 = vrot.slane %v523_v7, 1 }
 0x145   : > { %653 = vmatprep.mubr.f32.mxu1 %v526_v10  ;;  %v532_v13 = vsel %vm529_vm1, %v530_v9, %v531_v8  ;;  %v939_v8 = vld [vmem:[#allocation8 + $0x70] sm:$0xff]  ;;  %v938_v9 = vld [vmem:[#allocation8 + $0x68] sm:$0xff]  ;;  %v937_v10 = vld [vmem:[#allocation8 + $0x60] sm:$0xff] }
 0x146   : > { %654 = vmatmul.mubr.f32.vlgmr.msra.gmra.mxu1 %v523_v7  ;;  %1471 = vmatmul.mubr.f32.vlgmr.msra.gmra.mxu0 %v532_v13  ;;  %v940_v7 = vld [vmem:[#allocation8 + $0x78] sm:$0xff]  ;;  %v934_v13 = vld [vmem:[#allocation8 + $0x48] sm:$0xff] }
 0x147   : > { %1474 = vmatpush3.msra.mxu0 %v782_v11  ;;  %1318 = vmatpush3.msra.mxu1 %v750_v12  ;;  %v936_v11 = vld [vmem:[#allocation8 + $0x58] sm:$0xff]  ;;  %v935_v12 = vld [vmem:[#allocation8 + $0x50] sm:$0xff] }
 0x148   : > { %1475 = vmatprep.subr.mxu0 %v1883_v43  ;;  %1319 = vmatprep.subr.mxu1 %v765_v14  ;;  %v933_v14 = vld [vmem:[#allocation8 + $0x40] sm:$0xff] }
 0x149   : > { %1476 = vmatpush3.msra.mxu0 %v781_v15  ;;  %1320 = vmatpush3.msra.mxu1 %v749_v16  ;;  %v932_v15 = vld [vmem:[#allocation8 + $0x38] sm:$0xff]  ;;  %v931_v16 = vld [vmem:[#allocation8 + $0x30] sm:$0xff] }
 0x14a   : > { %1477 = vmatprep.subr.mxu0 %v1883_v43  ;;  %1321 = vmatprep.subr.mxu1 %v764_v17  ;;  %v930_v17 = vld [vmem:[#allocation8 + $0x28] sm:$0xff] }
 0x14b   : > { %1478 = vmatpush3.msra.mxu0 %v780_v18  ;;  %1322 = vmatpush3.msra.mxu1 %v748_v19  ;;  %v929_v18 = vld [vmem:[#allocation8 + $0x20] sm:$0xff]  ;;  %v928_v19 = vld [vmem:[#allocation8 + $0x18] sm:$0xff] }
 0x14c   : > { %1479 = vmatprep.subr.mxu0 %v1883_v43  ;;  %1323 = vmatprep.subr.mxu1 %v763_v20  ;;  %v927_v20 = vld [vmem:[#allocation8 + $0x10] sm:$0xff] }
 0x14d   : > { %1480 = vmatpush3.msra.mxu0 %v779_v21  ;;  %1324 = vmatpush3.msra.mxu1 %v747_v22  ;;  %v926_v21 = vld [vmem:[#allocation8 + $0x8] sm:$0xff]  ;;  %v925_v22 = vld [vmem:[#allocation8] sm:$0xff] }
 0x14e   : > { %1481 = vmatprep.subr.mxu0 %v1883_v43  ;;  %1325 = vmatprep.subr.mxu1 %v762_v23  ;;  %v1032_v23 = vld [vmem:[#allocation10 + $0x78] sm:$0xff] }
 0x14f   : > { %1482 = vmatpush3.msra.mxu0 %v778_v24  ;;  %1326 = vmatpush3.msra.mxu1 %v746_v25  ;;  %v1031_v24 = vld [vmem:[#allocation10 + $0x70] sm:$0xff]  ;;  %v1030_v25 = vld [vmem:[#allocation10 + $0x68] sm:$0xff] }
 0x150   : > { %1483 = vmatprep.subr.mxu0 %v1883_v43  ;;  %1327 = vmatprep.subr.mxu1 %v761_v26  ;;  %v1029_v26 = vld [vmem:[#allocation10 + $0x60] sm:$0xff] }
 0x151   : > { %1484 = vmatpush3.msra.mxu0 %v777_v27  ;;  %1328 = vmatpush3.msra.mxu1 %v745_v28  ;;  %v1028_v27 = vld [vmem:[#allocation10 + $0x58] sm:$0xff]  ;;  %v1027_v28 = vld [vmem:[#allocation10 + $0x50] sm:$0xff] }
 0x152   : > { %1485 = vmatprep.subr.mxu0 %v1883_v43  ;;  %1329 = vmatprep.subr.mxu1 %v760_v29  ;;  %v1026_v29 = vld [vmem:[#allocation10 + $0x48] sm:$0xff] }
 0x153   : > { %1486 = vmatpush3.msra.mxu0 %v776_v30  ;;  %1330 = vmatpush3.msra.mxu1 %v744_v31  ;;  %v1025_v30 = vld [vmem:[#allocation10 + $0x40] sm:$0xff]  ;;  %v1024_v31 = vld [vmem:[#allocation10 + $0x38] sm:$0xff] }
 0x154   : > { %1487 = vmatprep.subr.mxu0 %v1883_v43  ;;  %1331 = vmatprep.subr.mxu1 %v759_v32  ;;  %v1023_v32 = vld [vmem:[#allocation10 + $0x30] sm:$0xff] }
 0x155   : > { %1488 = vmatpush3.msra.mxu0 %v775_v33  ;;  %1332 = vmatpush3.msra.mxu1 %v743_v34 }
 0x156   : > { %1489 = vmatprep.subr.mxu0 %v1883_v43  ;;  %1333 = vmatprep.subr.mxu1 %v758_v35 }
 0x157   : > { %1490 = vmatpush3.msra.mxu0 %v774_v36  ;;  %1334 = vmatpush3.msra.mxu1 %v742_v37  ;;  %v783_v36 = vld [vmem:[%s2216_s5] sm:$0x1] }
 0x158   : > { %1491 = vmatprep.subr.mxu0 %v1883_v43  ;;  %1505 = vmatprep.mubr.msk.f32.mxu0 %vm1884_vm0, %v1883_v43 }
 0x159   : > { %1335 = vmatprep.subr.mxu1 %v757_v38  ;;  %1492 = vmatpush3.msra.mxu0 %v773_v39 }
 0x15a   : > { %1336 = vmatpush3.msra.mxu1 %v741_v40  ;;  %1493 = vmatprep.subr.mxu0 %v1883_v43 }
 0x15b   : > { %1337 = vmatprep.subr.mxu1 %v756_v41  ;;  %1494 = vmatpush3.msra.mxu0 %v772_v42  ;;  %v1022_v42 = vld [vmem:[#allocation10 + $0x28] sm:$0xff] }
 0x15c   : > { %1338 = vmatpush3.msra.mxu1 %v740_v44  ;;  %1495 = vmatprep.subr.mxu0 %v1883_v43  ;;  %v1021_v44 = vld [vmem:[#allocation10 + $0x20] sm:$0xff] }
 0x15d   : > { %1339 = vmatprep.subr.mxu1 %v755_v45  ;;  %1496 = vmatpush3.msra.mxu0 %v771_v46  ;;  %v1020_v45 = vld [vmem:[#allocation10 + $0x18] sm:$0xff]  ;;  %v1019_v46 = vld [vmem:[#allocation10 + $0x10] sm:$0xff] }
 0x15e   : > { %1340 = vmatpush3.msra.mxu1 %v739_v47  ;;  %1497 = vmatprep.subr.mxu0 %v1883_v43  ;;  %v1018_v47 = vld [vmem:[#allocation10 + $0x8] sm:$0xff] }
 0x15f   : > { %1341 = vmatprep.subr.mxu1 %v754_v48  ;;  %1498 = vmatpush3.msra.mxu0 %v770_v49  ;;  %v1017_v48 = vld [vmem:[#allocation10] sm:$0xff] }
 0x160   : > { %1342 = vmatpush3.msra.mxu1 %v738_v50  ;;  %1499 = vmatprep.subr.mxu0 %v1883_v43  ;;  %v941_v49 = vld [vmem:[%s2218_s7] sm:$0x1] }
 0x161   : > { %1343 = vmatprep.subr.mxu1 %v753_v51  ;;  %1500 = vmatpush3.msra.mxu0 %v769_v52 }
 0x162   : > { %1344 = vmatpush3.msra.mxu1 %v737_v53  ;;  %1501 = vmatprep.subr.mxu0 %v1883_v43 }
 0x163   : > { %1345 = vmatprep.subr.mxu1 %v752_v54  ;;  %1502 = vmatpush3.msra.mxu0 %v768_v55 }
 0x164   : > { %1346 = vmatpush3.msra.mxu1 %v736_v56  ;;  %1503 = vmatprep.subr.mxu0 %v1883_v43 }
 0x165   : > { %1347 = vmatprep.subr.mxu1 %v751_v57  ;;  %1504 = vmatpush3.msra.mxu0 %v767_v58 }
 0x166   : > { %1348 = vmatpush3.msra.mxu1 %v735_v59  ;;  %1543 = vmatprep.subr.mxu0 %v1883_v43 }
 0x167   : > { %1508 = vmatprep.subr.mxu1 %v1883_v43 }
 0x206   : > { %v1297_v60 = vpop.f32.mrf.mxu1  ;;  %v725_v61 = vpop.f32.mrf.mxu0 }
 0x208   : > { %v1298_v63 = vpop.f32.mrf.mxu1  ;;  %v1472_v0 = vpop.f32.mrf.mxu0 }
 0x209   : > { %v1299_v1 = vadd.f32 %v1298_v63, %v1297_v60 }
 0x20b   : > { %v656_v2 = vadd.f32 %v1299_v1, %v1242_v62 }
 0x20d   : > { %v726_v3 = vadd.f32 %v725_v61, %v656_v2 }
 0x20f   : > { %v2122_v4 = vmax.f32 %v726_v3, 0.0 }
 0x211   : > { %v731_v5 = vrot.slane %v2122_v4, 3  ;;  %v733_v6 = vrot.slane %v2122_v4, 6 }
 0x213   : > { %848 = vmatprep.mubr.f32.mxu1 %v731_v5  ;;  %1506 = vmatmul.mubr.f32.vlgmr.msra.gmra.mxu0 %v733_v6 }
 0x214   : > { %849 = vmatmul.mubr.f32.vlgmr.msra.gmra.mxu1 %v2122_v4  ;;  %1575 = vmatprep.mubr.msk.f32.mxu0 %vm1884_vm0, %v1883_v43 }
 0x215   : > { %1509 = vmatpush3.msra.mxu1 %v940_v7  ;;  %1540 = vmatprep.mubr.msk.f32.mxu1 %vm1884_vm0, %v1883_v43 }
 0x216   : > { %1510 = vmatprep.subr.mxu1 %v1883_v43  ;;  %1544 = vmatpush3.msra.mxu0 %v1032_v23 }
 0x217   : > { %1511 = vmatpush3.msra.mxu1 %v939_v8  ;;  %1545 = vmatprep.subr.mxu0 %v1883_v43 }
 0x218   : > { %1512 = vmatprep.subr.mxu1 %v1883_v43  ;;  %1546 = vmatpush3.msra.mxu0 %v1031_v24 }
 0x219   : > { %1513 = vmatpush3.msra.mxu1 %v938_v9  ;;  %1547 = vmatprep.subr.mxu0 %v1883_v43 }
 0x21a   : > { %1514 = vmatprep.subr.mxu1 %v1883_v43  ;;  %1548 = vmatpush3.msra.mxu0 %v1030_v25 }
 0x21b   : > { %1515 = vmatpush3.msra.mxu1 %v937_v10  ;;  %1549 = vmatprep.subr.mxu0 %v1883_v43 }
 0x21c   : > { %1516 = vmatprep.subr.mxu1 %v1883_v43  ;;  %1550 = vmatpush3.msra.mxu0 %v1029_v26 }
 0x21d   : > { %1517 = vmatpush3.msra.mxu1 %v936_v11  ;;  %1551 = vmatprep.subr.mxu0 %v1883_v43 }
 0x21e   : > { %1518 = vmatprep.subr.mxu1 %v1883_v43  ;;  %1552 = vmatpush3.msra.mxu0 %v1028_v27 }
 0x21f   : > { %1519 = vmatpush3.msra.mxu1 %v935_v12  ;;  %1553 = vmatprep.subr.mxu0 %v1883_v43 }
 0x220   : > { %1520 = vmatprep.subr.mxu1 %v1883_v43  ;;  %1554 = vmatpush3.msra.mxu0 %v1027_v28 }
 0x221   : > { %1521 = vmatpush3.msra.mxu1 %v934_v13  ;;  %1555 = vmatprep.subr.mxu0 %v1883_v43 }
 0x222   : > { %1522 = vmatprep.subr.mxu1 %v1883_v43  ;;  %1556 = vmatpush3.msra.mxu0 %v1026_v29 }
 0x223   : > { %1523 = vmatpush3.msra.mxu1 %v933_v14  ;;  %1557 = vmatprep.subr.mxu0 %v1883_v43 }
 0x224   : > { %1524 = vmatprep.subr.mxu1 %v1883_v43  ;;  %1558 = vmatpush3.msra.mxu0 %v1025_v30 }
 0x225   : > { %1525 = vmatpush3.msra.mxu1 %v932_v15  ;;  %1559 = vmatprep.subr.mxu0 %v1883_v43 }
 0x226   : > { %1526 = vmatprep.subr.mxu1 %v1883_v43  ;;  %1560 = vmatpush3.msra.mxu0 %v1024_v31 }
 0x227   : > { %1527 = vmatpush3.msra.mxu1 %v931_v16  ;;  %1561 = vmatprep.subr.mxu0 %v1883_v43 }
 0x228   : > { %1528 = vmatprep.subr.mxu1 %v1883_v43  ;;  %1562 = vmatpush3.msra.mxu0 %v1023_v32 }
 0x229   : > { %1529 = vmatpush3.msra.mxu1 %v930_v17  ;;  %1563 = vmatprep.subr.mxu0 %v1883_v43 }
 0x22a   : > { %1530 = vmatprep.subr.mxu1 %v1883_v43  ;;  %1564 = vmatpush3.msra.mxu0 %v1022_v42 }
 0x22b   : > { %1531 = vmatpush3.msra.mxu1 %v929_v18  ;;  %1565 = vmatprep.subr.mxu0 %v1883_v43 }
 0x22c   : > { %1532 = vmatprep.subr.mxu1 %v1883_v43  ;;  %1566 = vmatpush3.msra.mxu0 %v1021_v44 }
 0x22d   : > { %1533 = vmatpush3.msra.mxu1 %v928_v19  ;;  %1567 = vmatprep.subr.mxu0 %v1883_v43 }
 0x22e   : > { %1534 = vmatprep.subr.mxu1 %v1883_v43  ;;  %1568 = vmatpush3.msra.mxu0 %v1020_v45 }
 0x22f   : > { %1535 = vmatpush3.msra.mxu1 %v927_v20  ;;  %1569 = vmatprep.subr.mxu0 %v1883_v43 }
 0x230   : > { %1536 = vmatprep.subr.mxu1 %v1883_v43  ;;  %1570 = vmatpush3.msra.mxu0 %v1019_v46 }
 0x231   : > { %1537 = vmatpush3.msra.mxu1 %v926_v21  ;;  %1571 = vmatprep.subr.mxu0 %v1883_v43 }
 0x232   : > { %1538 = vmatprep.subr.mxu1 %v1883_v43  ;;  %1572 = vmatpush3.msra.mxu0 %v1018_v47 }
 0x233   : > { %1539 = vmatpush3.msra.mxu1 %v925_v22  ;;  %1573 = vmatprep.subr.mxu0 %v1883_v43  ;;  %v1033_v43 = vld [vmem:[%s2220_s9] sm:$0x1] }
 0x234   : > { %1574 = vmatpush3.msra.mxu0 %v1017_v48 }
 0x2d3   : > { %v920_v33 = vpop.f32.mrf.mxu0 }
 0x2d4   : > { %v1349_v34 = vpop.f32.mrf.mxu1 }
 0x2d5   : > { %v1507_v35 = vpop.f32.mrf.mxu0 }
 0x2d6   : > { %v1350_v37 = vpop.f32.mrf.mxu1 }
 0x2d7   : > { %v1351_v38 = vadd.f32 %v1350_v37, %v1349_v34 }
 0x2d9   : > { %v851_v39 = vadd.f32 %v1351_v38, %v783_v36 }
 0x2db   : > { %v921_v40 = vadd.f32 %v920_v33, %v851_v39 }
 0x2dd   : > { %v924_v41 = vmax.f32 %v921_v40, 0.0 }
 0x2df   : > { %1541 = vmatmul.mubr.f32.vlgmr.msra.gmra.mxu1 %v924_v41 }
 0x39f   : > { %v1008_v50 = vpop.f32.mrf.mxu1 }
 0x3a0   : > { %v1009_v51 = vadd.f32 %v1008_v50, %v941_v49 }
 0x3a1   : > { %v1542_v52 = vpop.f32.mrf.mxu1 }
 0x3a2   : > { %v1012_v53 = vmax.f32 %v1009_v51, 0.0 }
 0x3a4   : > { %v1014_v54 = vrot.slane %v1012_v53, 5 }
 0x3a6   : > { %v1016_v55 = vadd.f32 %v1014_v54, %v2122_v4 }
 0x3a8   : > { %v1035_v56 = vrot.slane %v1016_v55, 3 }
 0x3aa   : > { %1576 = vmatmul.mubr.f32.vlgmr.msra.gmra.mxu0 %v1035_v56 }
 0x46a   : > { %v1103_v57 = vpop.f32.mrf.mxu0 }
 0x46b   : > { %v1104_v58 = vadd.f32 %v1103_v57, %v1033_v43 }
 0x46c   : > { %v1577_v59 = vpop.f32.mrf.mxu0 }
 0x46d   : > { %1107 = vst [vmem:[%s424_s28] sm:$0x1] %v1104_v58 }
 0x46e   : > { %1815 = shalt.err (!%p1812_p0)
}
 0x46f   : > { %s1816_s27 = scalar_lea.hbm %s2176_s30, 16  ;;  %s1820_s15 = scalar_lea.hbm %s2221_s10, 32 }
 0x470   : > { %p1817_p3 = scmp.ne.s32.totalorder %s2176_s30, %s1816_s27  ;;  %p1821_p12 = scmp.lt.s32.totalorder %s2176_s30, %s2221_s10 }
 0x471   : > { %p1822_p10 = scmp.lt.s32.totalorder %s1820_s15, %s1816_s27 }
 0x472   : > { %p1818_p1 = pnand %p1817_p3, %p1979_p5 }
 0x473   : > { %p1823_p4 = por %p1822_p10, %p1821_p12 }
 0x474   : > { %p1819_p2 = pneg %p1818_p1 }
 0x476   : > { %p1824_p9 = pnand %p1823_p4, %p1819_p2 }
 0x478   : > { %1827 = shalt.err (!%p1824_p9)
}
 0x479   : > { %1598 = dma.vmem_to_hbm [thread:$0]  (%p1979_p5), %s1122_s18, 16, %s2176_s30, %s1109_s29  }
 0x47a PF: > { %p1630_p8 = scmp.ge.s32.totalorder %s1874_s16, 2  ;;  %s1133_s21 = sand.u32 1, %s1862_s13  }
 0x47b   : > { %s1134_s26 = scalar_lea.sflag [#allocation4], %s1133_s21 }
 0x47c   : > { %p1617_p7 = pnand %p1630_p8, %p1983_p6 }
 0x47e   : > { %p1618_p11 = pneg %p1617_p7 }
 0x480   : > { %1857 = dma.done.wait (%p1618_p11), %s1134_s26, 16  }
 0x481   : > { %1859 = vsyncadd (%p1618_p11), %s1134_s26, 4294967280  ;;  %s2239_s11 = sld [smem:[#allocation16_spill]]  ;;  %p23_p13 = scmp.ge.s32.totalorder %s1966_s19, 4  }
 0x482   : > { %s2240_s15 = sld [smem:[#allocation17_spill]]  ;;  %s2241_s13 = smov %s1866_s14 }
 0x483   : > { %s2243_s16 = smov %s1966_s19  ;;  %25 = sbr.rel (!%p23_p13) target bundleno = 8 (0x8), region = 116 }
 0x487   : > { %s2242_s14 = smov %s2239_s11 }
 0x488   :  { %1138 = vsyncpa [#allocation3], 1 }
 0x489   :  { %1140 = vsyncpa [#allocation3 + $0x1], 1 }
 0x48a   :  { %1141 = vsyncpa [#allocation6], 1 }
 0x48b   :  { %1142 = vsyncpa [#allocation9], 1 }
 0x48c   :  { %1143 = vsyncpa [#allocation4], 1 }
 0x48d   :  { %1145 = vsyncpa [#allocation4 + $0x1], 1 }

</bundles_post_ra>
